<compile_context>
chip_gen: v7x
topology: tpu7x:2x2x1
jax: 0.10.0
libtpu: 0.0.40
codegen_flags: <defaults>
</compile_context>

<pallas_src>
import jax
import jax.numpy as jnp
from jax.experimental import pallas as pl
from jax.experimental.pallas import tpu as pltpu

_LANES = 512               # lane-dense last dim (multiple of 128) -> unmasked vst
_MAX_TILE_ROWS = 2048      # 2048*512*4B = 4 MiB f32 tile; in+out double-buffered ~16 MiB
_SMALL_FALLBACK_ELEMS = 8 * _LANES  # below this, plain jnp is strictly faster


def linreg_kernel(w_ref, b_ref, x_ref, o_ref):
    # w_ref, b_ref: (1, 1) f32 scalars in SMEM; x_ref / o_ref: (TM, _LANES) VMEM tiles.
    w = w_ref[0, 0]
    b = b_ref[0, 0]
    x = x_ref[...].astype(jnp.float32)
    o_ref[...] = (x * w + b).astype(o_ref.dtype)


def linear_regression(x, weight, bias):
    """y = x * w + b for nn.Linear(1, 1, bias=True). x: [..., 1]; dtype-preserving."""
    orig_shape = x.shape
    out_dtype = x.dtype
    w_scalar = weight.reshape(()).astype(jnp.float32)
    b_scalar = bias.reshape(()).astype(jnp.float32)

    x_flat = x.reshape(-1)
    total = x_flat.shape[0]

    # Tiny inputs: a fused XLA elementwise op beats pad/reshape + kernel launch overhead.
    if total < _SMALL_FALLBACK_ELEMS:
        y = (x_flat.astype(jnp.float32) * w_scalar + b_scalar).astype(out_dtype)
        return y.reshape(orig_shape)

    # Lane-aligned inputs are copy-free; only ragged inputs pad the (< _LANES) tail.
    rem = total % _LANES
    if rem:
        # TODO(synk): for very large ragged inputs this jnp.pad is still a full extra
        # HBM pass; a split bulk-kernel + tiny-tail path (or allow_input_fusion) would
        # avoid it entirely.
        x_flat = jnp.pad(x_flat, (0, _LANES - rem))
    rows = x_flat.shape[0] // _LANES
    x2d = x_flat.reshape(rows, _LANES)

    # Tile selection is decoupled from padding: large tiles amortize per-step overhead,
    # the grid uses cdiv, and Pallas masks the partial edge block. If rows < max tile,
    # the block equals the full array dim (allowed by the (8,128) rule).
    tile_rows = _MAX_TILE_ROWS if rows >= _MAX_TILE_ROWS else rows
    grid = (pl.cdiv(rows, tile_rows),)

    w2d = w_scalar.reshape(1, 1)
    b2d = b_scalar.reshape(1, 1)

    n_elems = rows * _LANES
    cost = pl.CostEstimate(
        flops=2 * n_elems,
        transcendentals=0,
        bytes_accessed=n_elems * (jnp.dtype(x.dtype).itemsize + jnp.dtype(out_dtype).itemsize),
    )

    out2d = pl.pallas_call(
        linreg_kernel,
        out_shape=jax.ShapeDtypeStruct((rows, _LANES), out_dtype),
        grid=grid,
        in_specs=[
            pl.BlockSpec(memory_space=pltpu.MemorySpace.SMEM),    # weight scalar
            pl.BlockSpec(memory_space=pltpu.MemorySpace.SMEM),    # bias scalar
            pl.BlockSpec((tile_rows, _LANES), lambda i: (i, 0)),  # x tile
        ],
        out_specs=pl.BlockSpec((tile_rows, _LANES), lambda i: (i, 0)),
        compiler_params=pltpu.CompilerParams(
            # "parallel" is portable across v5e/v6e/v7x. On v7x, CORE_PARALLEL (or an
            # explicit pl.core_map over create_tensorcore_mesh) is what actually splits
            # this streaming grid across both TensorCores; kept "parallel" here so the
            # same script runs cleanly on single-TC chips.
            dimension_semantics=("parallel",),
            # 4 MiB tiles double-buffered for input+output ~= 16 MiB pipelined VMEM;
            # raise the limit so v5e's 16 MiB default scoped VMEM does not reject it.
            vmem_limit_bytes=32 << 20,
        ),
        cost_estimate=cost,
    )(w2d, b2d, x2d)

    y_flat = out2d.reshape(-1)
    if rem:
        y_flat = y_flat[:total]
    return y_flat.reshape(orig_shape)


if __name__ == "__main__":
    key = jax.random.PRNGKey(0)
    kx1, kx2, kx3, kw, kb = jax.random.split(key, 5)

    # nn.Linear(1, 1) parameter shapes: weight (out=1, in=1), bias (1,)
    weight = jax.random.uniform(kw, (1, 1), dtype=jnp.float32, minval=-1.0, maxval=1.0)
    bias = jax.random.uniform(kb, (1,), dtype=jnp.float32, minval=-1.0, maxval=1.0)

    def ref(x):
        return x @ weight.T + bias

    # 1) tiny input  -> fused-jnp fallback path
    x_small = jax.random.normal(kx1, (8, 1), dtype=jnp.float32)
    # 2) lane-aligned input -> kernel path, no pad / no output slice
    x_aligned = jax.random.normal(kx2, (8192, 1), dtype=jnp.float32)
    # 3) ragged input -> kernel path with tail padding
    x_ragged = jax.random.normal(kx3, (6000, 1), dtype=jnp.float32)

    for x in (x_small, x_aligned, x_ragged):
        out = jax.block_until_ready(linear_regression(x, weight, bias))
        assert out.shape == x.shape
        assert out.dtype == x.dtype
        assert jnp.allclose(out, ref(x), atol=1e-5, rtol=1e-5)

    print("KERNEL_OK")
</pallas_src>

<mosaic_0001>
module attributes {stable_mosaic.version = 11 : i64} {
  func.func @linreg_kernel(%arg0: i32, %arg1: memref<1x1xf32, #tpu.memory_space<smem>>, %arg2: memref<1x1xf32, #tpu.memory_space<smem>>, %arg3: memref<16x512xf32, #tpu.memory_space<vmem>>, %arg4: memref<16x512xf32, #tpu.memory_space<vmem>>) attributes {dimension_semantics = [#tpu.dimension_semantics<parallel>], iteration_bounds = array<i64: 1>, scalar_prefetch = 0 : i64, scratch_operands = 0 : i64, tpu.core_type = #tpu.core_type<tc>, window_params = [{transform_indices = @transform_0, window_bounds = array<i64: 1, 1>}, {transform_indices = @transform_1, window_bounds = array<i64: 1, 1>}, {transform_indices = @transform_2, window_bounds = array<i64: 16, 512>}, {transform_indices = @transform_3, window_bounds = array<i64: 16, 512>}]} {
    %c0 = arith.constant 0 : index
    %c0_0 = arith.constant 0 : index
    %0 = memref.load %arg1[%c0, %c0_0] : memref<1x1xf32, #tpu.memory_space<smem>>
    %c0_1 = arith.constant 0 : index
    %c0_2 = arith.constant 0 : index
    %1 = memref.load %arg2[%c0_1, %c0_2] : memref<1x1xf32, #tpu.memory_space<smem>>
    %c0_3 = arith.constant 0 : index
    %c0_4 = arith.constant 0 : index
    %2 = vector.load %arg3[%c0_3, %c0_4] : memref<16x512xf32, #tpu.memory_space<vmem>>, vector<16x512xf32>
    %3 = vector.broadcast %0 : f32 to vector<16x512xf32>
    %4 = arith.mulf %2, %3 : vector<16x512xf32>
    %5 = vector.broadcast %1 : f32 to vector<16x512xf32>
    %6 = arith.addf %4, %5 : vector<16x512xf32>
    %c0_5 = arith.constant 0 : index
    %c0_6 = arith.constant 0 : index
    %7 = vector.load %arg4[%c0_5, %c0_6] : memref<16x512xf32, #tpu.memory_space<vmem>>, vector<16x512xf32>
    tpu.vector_store %arg4[%c0_5, %c0_6], %6 {strides = array<i32>} : memref<16x512xf32, #tpu.memory_space<vmem>>, vector<16x512xf32>,
    return
  }
  func.func @transform_0(%arg0: i32) -> (i32, i32) {
    %c0_i32 = arith.constant 0 : i32
    %c0_i32_0 = arith.constant 0 : i32
    %c0_i32_1 = arith.constant 0 : i32
    return %c0_i32, %c0_i32_0 : i32, i32
  }
  func.func @transform_1(%arg0: i32) -> (i32, i32) {
    %c0_i32 = arith.constant 0 : i32
    %c0_i32_0 = arith.constant 0 : i32
    %c0_i32_1 = arith.constant 0 : i32
    return %c0_i32, %c0_i32_0 : i32, i32
  }
  func.func @transform_2(%arg0: i32) -> (i32, i32) {
    %c0_i32 = arith.constant 0 : i32
    %c0_i32_0 = arith.constant 0 : i32
    return %arg0, %c0_i32 : i32, i32
  }
  func.func @transform_3(%arg0: i32) -> (i32, i32) {
    %c0_i32 = arith.constant 0 : i32
    %c0_i32_0 = arith.constant 0 : i32
    return %arg0, %c0_i32 : i32, i32
  }
}

</mosaic_0001>

<bundles_post_ra>
// kernel: tpu_custom_call.1
= control target key start
LH: loop header
LB: loop body
LE: loop exit
PB: predicated region body
PF: predicated region fallthrough
CT: control target
= control target key end

     0   :  { %10 = vsyncpa [#allocation5], 0  ;;  %s196_s0 = inlined_call_operand.<no memory space> [shape: f32[1,1], index: 0, kind: input, shape index: {}]   ;;  %s197_s1 = inlined_call_operand.<no memory space> [shape: f32[1,1], index: 1, kind: input, shape index: {}]   ;;  %s198_s2 = inlined_call_operand.hbm [shape: f32[16,512], index: 2, kind: input, shape index: {}]   ;;  %s199_s3 = inlined_call_operand.hbm [shape: f32[16,512], index: 3, kind: output, shape index: {}]  }
   0x1   :  { %11 = vsyncpa [#allocation6], 0  ;;  %s136_s12 = smov [#allocation4]   ;;  %s88_s16 = scalar_lea.hbm %s198_s2, 1024 }
   0x2   :  { %s21_s13 = sshll.u32 %s136_s12, 4  ;;  %p89_p0 = scmp.ne.s32.totalorder %s198_s2, %s88_s16  ;;  %s22_s13 = int_to_ptr.vmem [resolvable:$true] %s21_s13 }
   0x3   :  { %p92_p1 = scmp.lt.u32.totalorder %s88_s16, %s198_s2 }
   0x5   :  { %p94_p2 = pnand %p92_p1, %p89_p0 }
   0x7   :  { %97 = shalt.err (!%p94_p2)
}
   0x8   :  { %s98_s21 = scalar_lea.vmem %s22_s13, 1024  ;;  %p103_p4 = scmp.lt.s32.totalorder %s22_s13, %s22_s13 }
   0x9   :  { %p99_p3 = scmp.ne.s32.totalorder %s22_s13, %s98_s21  ;;  %p104_p5 = scmp.lt.s32.totalorder %s98_s21, %s98_s21 }
   0xb   :  { %p105_p6 = por %p104_p5, %p103_p4 }
   0xd   :  { %p106_p7 = pnand %p105_p6, %p99_p3 }
   0xf   :  { %109 = shalt.err (!%p106_p7)
}
  0x10   :  { %s137_s22 = smov 512   ;;  %s138_s23 = smov 32  }
  0x11   :  { %27 = dma.hbm_to_vmem [thread:$0]  %s198_s2, 1024, %s22_s13, [#allocation5], %s137_s22, %s137_s22, %s138_s23  }
  0x12   :  { %132 = dma.done.wait [#allocation5], 1024  }
  0x13   :  { %133 = vsyncadd [#allocation5], 4294966272  ;;  %v41_v0 = vstv %s196_s0  ;;  %v33_v1 = vld [vmem:[#allocation4] sm:$0xff]  ;;  %v50_v2 = vstv %s197_s1  ;;  %v34_v3 = vld [vmem:[#allocation4 + $0x8] sm:$0xff]  ;;  %s139_s0 = smov [#allocation7]  }
  0x14   :  { %v35_v4 = vld [vmem:[#allocation4 + $0x10] sm:$0xff]  ;;  %v42_v5 = vmul.f32 %v41_v0, %v33_v1  ;;  %v43_v6 = vmul.f32 %v41_v0, %v34_v3  ;;  %v36_v8 = vld [vmem:[#allocation4 + $0x18] sm:$0xff]  ;;  %v37_v9 = vld [vmem:[#allocation4 + $0x20] sm:$0xff]  ;;  %s72_s2 = sshll.u32 %s139_s0, 4  ;;  %s73_s2 = int_to_ptr.vmem [resolvable:$true] %s72_s2 }
  0x15   :  { %v44_v7 = vmul.f32 %v41_v0, %v35_v4  ;;  %v38_v10 = vld [vmem:[#allocation4 + $0x28] sm:$0xff]  ;;  %v45_v11 = vmul.f32 %v41_v0, %v36_v8  ;;  %v46_v12 = vmul.f32 %v41_v0, %v37_v9  ;;  %v39_v14 = vld [vmem:[#allocation4 + $0x30] sm:$0xff]  ;;  %v40_v15 = vld [vmem:[#allocation4 + $0x38] sm:$0xff]  ;;  %s110_s1 = scalar_lea.vmem %s73_s2, 1024  ;;  %p115_p9 = scmp.lt.s32.totalorder %s73_s2, %s73_s2 }
  0x16   :  { %v47_v13 = vmul.f32 %v41_v0, %v38_v10  ;;  %v51_v16 = vadd.f32 %v50_v2, %v42_v5  ;;  %v52_v17 = vadd.f32 %v50_v2, %v43_v6  ;;  %v48_v19 = vmul.f32 %v41_v0, %v39_v14  ;;  %p111_p8 = scmp.ne.s32.totalorder %s73_s2, %s110_s1  ;;  %p116_p10 = scmp.lt.s32.totalorder %s110_s1, %s110_s1 }
  0x17   :  { %v53_v18 = vadd.f32 %v50_v2, %v44_v7  ;;  %v54_v20 = vadd.f32 %v50_v2, %v45_v11  ;;  %v55_v21 = vadd.f32 %v50_v2, %v46_v12  ;;  %v49_v23 = vmul.f32 %v41_v0, %v40_v15 }
  0x18   :  { %v56_v22 = vadd.f32 %v50_v2, %v47_v13  ;;  %59 = vst [vmem:[#allocation7] sm:$0xff] %v51_v16  ;;  %60 = vst [vmem:[#allocation7 + $0x8] sm:$0xff] %v52_v17  ;;  %v57_v24 = vadd.f32 %v50_v2, %v48_v19  ;;  %p117_p11 = por %p116_p10, %p115_p9 }
  0x19   :  { %61 = vst [vmem:[#allocation7 + $0x10] sm:$0xff] %v53_v18  ;;  %62 = vst [vmem:[#allocation7 + $0x18] sm:$0xff] %v54_v20  ;;  %v58_v25 = vadd.f32 %v50_v2, %v49_v23 }
  0x1a   :  { %63 = vst [vmem:[#allocation7 + $0x20] sm:$0xff] %v55_v21  ;;  %64 = vst [vmem:[#allocation7 + $0x28] sm:$0xff] %v56_v22  ;;  %p118_p12 = pnand %p117_p11, %p111_p8 }
  0x1b   :  { %65 = vst [vmem:[#allocation7 + $0x30] sm:$0xff] %v57_v24  ;;  %66 = vst [vmem:[#allocation7 + $0x38] sm:$0xff] %v58_v25 }
  0x1c   :  { %121 = shalt.err (!%p118_p12)
}
  0x1d   :  { %s122_s5 = scalar_lea.hbm %s199_s3, 1024 }
  0x1e   :  { %p123_p13 = scmp.ne.s32.totalorder %s199_s3, %s122_s5  ;;  %p126_p0 = scmp.lt.u32.totalorder %s122_s5, %s199_s3 }
  0x20   :  { %p128_p1 = pnand %p126_p0, %p123_p13 }
  0x22   :  { %131 = shalt.err (!%p128_p1)
}
  0x23   :  { %78 = dma.vmem_to_hbm [thread:$0]  %s73_s2, 1024, %s199_s3, [#allocation6], %s137_s22, %s137_s22, %s138_s23  }
  0x24   :  { %134 = dma.done.wait [#allocation6], 1024  }
  0x25   :  { %135 = vsyncadd [#allocation6], 4294966272 }
  0x26   :  { %82 = vsyncpa [#allocation5], 1 }
  0x27   :  { %83 = vsyncpa [#allocation6], 1 }

</bundles_post_ra>
